<compile_context>
chip_gen: v5e
topology: v5e:2x2
jax: 0.10.0
libtpu: 0.0.40
codegen_flags: <defaults>
</compile_context>

<pallas_src>
import math

import jax
import jax.numpy as jnp
import numpy as np
from jax.experimental import pallas as pl
from jax.experimental.pallas import tpu as pltpu


_LANE = 128
_SUBLANE = 8
# ~2 MiB x-block; with input + output double-buffered this is ~8 MiB of VMEM,
# comfortably inside the 32 MiB default scoped limit on v5e/v6e and leaving
# large headroom on v7x (64 MiB physical VMEM).
_DEFAULT_BLOCK_BYTES = 2 * 1024 * 1024


# ----------------------------- Pallas kernel ---------------------------------

def _ash_kernel(x_ref, th_ref, o_ref):
    """Per-row threshold: y = x if x > th(row) else 0."""
    x = x_ref[...]                        # (TN, TS), native input dtype
    th = th_ref[...]                      # (TN, 1), float32
    keep = x.astype(jnp.float32) > th     # broadcast threshold across lanes
    o_ref[...] = jnp.where(keep, x, jnp.zeros_like(x))


# ----------------------------- tiling helper ---------------------------------

def _choose_tiles(n, s, itemsize, block_bytes):
    # Row tile: whole batch if it fits the sublane rule, else 8 rows.
    tn = n if n <= _SUBLANE else _SUBLANE
    # Lane tile: as large as the VMEM budget allows, multiple of 128 lanes.
    ts_cap = max(_LANE, (block_bytes // (tn * itemsize)) // _LANE * _LANE)
    ts = s if s <= ts_cap else ts_cap     # full extent is always legal
    return tn, ts


# ----------------------------- wrapper ----------------------------------------

def ash(x, k_ash_, *, block_bytes=_DEFAULT_BLOCK_BYTES):
    """JAX/Pallas port of ASH.forward(input, k_ash_) (forward pass only)."""
    n = x.shape[0]
    s = math.prod(x.shape[1:])
    flat = x.reshape(n, s)

    # Reference: th = np.percentile(sample, int((1 - k) * 100)) per sample.
    # int() truncation matches the torch module exactly.
    # Percentile (sort/partition) stays in XLA glue — no clean Pallas sort.
    q = int((1.0 - float(k_ash_)) * 100)
    th = jnp.percentile(flat.astype(jnp.float32), q, axis=1, keepdims=True)  # (n,1) f32

    tn, ts = _choose_tiles(n, s, jnp.dtype(x.dtype).itemsize, block_bytes)
    grid = (pl.cdiv(n, tn), pl.cdiv(s, ts))

    out = pl.pallas_call(
        _ash_kernel,
        out_shape=jax.ShapeDtypeStruct((n, s), x.dtype),
        grid=grid,
        in_specs=[
            pl.BlockSpec((tn, ts), lambda i, j: (i, j)),   # x tile
            pl.BlockSpec((tn, 1), lambda i, j: (i, 0)),    # per-row threshold
        ],
        out_specs=pl.BlockSpec((tn, ts), lambda i, j: (i, j)),
        compiler_params=pltpu.CompilerParams(
            dimension_semantics=("parallel", "parallel")),
    )(flat, th)
    return out.reshape(x.shape)


class ASH:
    """Forward-only port of the torch ASH module (functional: returns new array)."""

    def __call__(self, x, k_ash_):
        return ash(x, k_ash_)

    forward = __call__


# ----------------------------- reference + smoke test ------------------------

def _reference(x, k_ash_):
    # Same semantics; uses the same percentile glue so the check isolates the
    # Pallas thresholding kernel.
    n = x.shape[0]
    flat = x.reshape(n, -1)
    q = int((1.0 - float(k_ash_)) * 100)
    th = jnp.percentile(flat.astype(jnp.float32), q, axis=1, keepdims=True)
    ref = jnp.where(flat.astype(jnp.float32) > th, flat, jnp.zeros_like(flat))
    return ref.reshape(x.shape)


if __name__ == "__main__":
    key1, key2 = jax.random.split(jax.random.PRNGKey(0))
    mod = ASH()

    # Small NCHW input, typical of the module's use.
    x1 = jax.random.normal(key1, (2, 4, 16, 16), dtype=jnp.float32)
    out1 = mod(x1, 0.9)                         # 10th-percentile threshold
    jax.block_until_ready(out1)
    np.testing.assert_allclose(np.asarray(out1), np.asarray(_reference(x1, 0.9)),
                               rtol=0, atol=0)

    # Tiny block budget forces lane-dim tiling (grid=(1, 2)) to exercise the
    # multi-block index maps and threshold re-mapping.
    out1b = ash(x1, 0.9, block_bytes=4096)
    jax.block_until_ready(out1b)
    np.testing.assert_allclose(np.asarray(out1b), np.asarray(out1), rtol=0, atol=0)

    # Larger batch exercises the row-tile grid axis (tn=8, two row blocks) and
    # the int() truncation path: int((1 - 0.65) * 100) == 34.
    x2 = jax.random.normal(key2, (16, 4, 8, 8), dtype=jnp.float32)
    out2 = mod(x2, 0.65)
    jax.block_until_ready(out2)
    np.testing.assert_allclose(np.asarray(out2), np.asarray(_reference(x2, 0.65)),
                               rtol=0, atol=0)

    assert out1.shape == x1.shape and out1.dtype == x1.dtype
    assert out2.shape == x2.shape and out2.dtype == x2.dtype
    print("KERNEL_OK")
</pallas_src>

<mosaic_0001>
module attributes {stable_mosaic.version = 11 : i64} {
  func.func @_ash_kernel(%arg0: i32, %arg1: i32, %arg2: memref<2x1024xf32, #tpu.memory_space<vmem>>, %arg3: memref<2x1xf32, #tpu.memory_space<vmem>>, %arg4: memref<2x1024xf32, #tpu.memory_space<vmem>>) attributes {dimension_semantics = [#tpu.dimension_semantics<parallel>, #tpu.dimension_semantics<parallel>], iteration_bounds = array<i64: 1, 1>, scalar_prefetch = 0 : i64, scratch_operands = 0 : i64, tpu.core_type = #tpu.core_type<tc>, window_params = [{transform_indices = @transform_0, window_bounds = array<i64: 2, 1024>}, {transform_indices = @transform_1, window_bounds = array<i64: 2, 1>}, {transform_indices = @transform_2, window_bounds = array<i64: 2, 1024>}]} {
    %c0 = arith.constant 0 : index
    %c0_0 = arith.constant 0 : index
    %0 = vector.load %arg2[%c0, %c0_0] : memref<2x1024xf32, #tpu.memory_space<vmem>>, vector<2x1024xf32>
    %c0_1 = arith.constant 0 : index
    %c0_2 = arith.constant 0 : index
    %1 = vector.load %arg3[%c0_1, %c0_2] : memref<2x1xf32, #tpu.memory_space<vmem>>, vector<2x1xf32>
    %2 = vector.broadcast %1 : vector<2x1xf32> to vector<2x1024xf32>
    %3 = arith.cmpf ogt, %0, %2 : vector<2x1024xf32>
    %cst = arith.constant 0.000000e+00 : f32
    %4 = vector.broadcast %cst : f32 to vector<2x1024xf32>
    %5 = arith.select %3, %0, %4 : vector<2x1024xi1>, vector<2x1024xf32>
    %c0_3 = arith.constant 0 : index
    %c0_4 = arith.constant 0 : index
    %6 = vector.load %arg4[%c0_3, %c0_4] : memref<2x1024xf32, #tpu.memory_space<vmem>>, vector<2x1024xf32>
    tpu.vector_store %arg4[%c0_3, %c0_4], %5 {strides = array<i32>} : memref<2x1024xf32, #tpu.memory_space<vmem>>, vector<2x1024xf32>,
    return
  }
  func.func @transform_0(%arg0: i32, %arg1: i32) -> (i32, i32) {
    %c0_i32 = arith.constant 0 : i32
    return %arg0, %arg1 : i32, i32
  }
  func.func @transform_1(%arg0: i32, %arg1: i32) -> (i32, i32) {
    %c0_i32 = arith.constant 0 : i32
    %c0_i32_0 = arith.constant 0 : i32
    return %arg0, %c0_i32 : i32, i32
  }
  func.func @transform_2(%arg0: i32, %arg1: i32) -> (i32, i32) {
    %c0_i32 = arith.constant 0 : i32
    return %arg0, %arg1 : i32, i32
  }
}

</mosaic_0001>

<bundles_post_ra>
// kernel: tpu_custom_call.1
= control target key start
LH: loop header
LB: loop body
LE: loop exit
PB: predicated region body
PF: predicated region fallthrough
CT: control target
= control target key end

     0   :  { %7 = vsyncpa [#allocation3], 0  ;;  %s146_s0 = inlined_call_operand.hbm [shape: f32[2,1024], index: 0, kind: input, shape index: {}]   ;;  %s147_s1 = inlined_call_operand.vmem [shape: f32[2,1], index: 1, kind: input, shape index: {}]   ;;  %s148_s2 = inlined_call_operand.hbm [shape: f32[2,1024], index: 2, kind: output, shape index: {}]  }
   0x1   :  { %8 = vsyncpa [#allocation4], 0  ;;  %s14_s11 = sshll.u32 %s146_s0, 4  ;;  %s118_s12 = smov [#allocation2]   ;;  %s15_s11 = int_to_ptr.hbm [resolvable:$true] %s14_s11 }
   0x2   :  { %s16_s13 = sshll.u32 %s118_s12, 4  ;;  %s17_s13 = int_to_ptr.vmem [resolvable:$true] %s16_s13 }
   0x3   :  { %19 = dma.hbm_to_vmem [thread:$0]  %s15_s11, 256, %s17_s13, [#allocation3]  }
   0x4   :  { %114 = dma.done.wait [#allocation3], 256  }
   0x5   :  { %115 = vsyncadd [#allocation3], 4294967040  ;;  %v119_v0 = vmov 0   ;;  %v28_v1 = vld [vmem:[%s147_s1] sm:$0x3]  ;;  %v27_v7 = vld [vmem:[#allocation2 + $0x8] sm:$0xff] }
   0x6   :  { %65 = vset.pattern.permute.xlu0 %v119_v0  ;;  %v120_v2 = vmov 269488144   ;;  %v26_v6 = vld [vmem:[#allocation2] sm:$0xff]  ;;  %s121_s0 = smov [#allocation5]   ;;  %s51_s19 = sshll.u32 %s148_s2, 4  ;;  %s52_s19 = int_to_ptr.hbm [resolvable:$true] %s51_s19 }
   0x7   :  { %31 = vperm.xlu0 %65, %v28_v1   ;;  %v34_v3 = vunpack.c.l.s4 %v120_v2  ;;  %s49_s16 = sshll.u32 %s121_s0, 4  ;;  %s50_s16 = int_to_ptr.vmem [resolvable:$true] %s49_s16 }
   0x9   :  { %v35_v4 = vunpack.c.0.s8 %v34_v3 }
  0x79   :  { %v32_v5 = vpop.permute.xlu0 %31 }
  0x7a   :  { %v36_v8 = vperm.slane %v32_v5, %v35_v4 }
  0x7c   :  { %vm38_vm0 = vcmp.gt.f32.partialorder %v26_v6, %v36_v8  ;;  %vm39_vm1 = vcmp.gt.f32.partialorder %v27_v7, %v36_v8 }
  0x7d   :  { %v40_v9 = vsel %vm38_vm0, %v26_v6, 0.0  ;;  %v41_v10 = vsel %vm39_vm1, %v27_v7, 0.0 }
  0x7e   :  { %42 = vst [vmem:[#allocation5] sm:$0xff] %v40_v9 }
  0x7f   :  { %43 = vst [vmem:[#allocation5 + $0x8] sm:$0xff] %v41_v10 }
  0x80   :  { %54 = dma.vmem_to_hbm [thread:$0]  %s50_s16, 256, %s52_s19, [#allocation4]  }
  0x81   :  { %116 = dma.done.wait [#allocation4], 256  }
  0x82   :  { %117 = vsyncadd [#allocation4], 4294967040 }
  0x83   :  { %59 = vsyncpa [#allocation3], 1 }
  0x84   :  { %60 = vsyncpa [#allocation4], 1 }

</bundles_post_ra>
